<compile_context>
chip_gen: v5e
topology: v5e:2x2
jax: 0.10.0
libtpu: 0.0.40
codegen_flags: <defaults>
</compile_context>

<pallas_src>
import jax
import jax.numpy as jnp
from jax.experimental import pallas as pl
from jax.experimental.pallas import tpu as pltpu

IN_DIM = 10
HID_DIM = 5
OUT_DIM = 1

# Packed parameter layout (flat f32[61] in SMEM): w1 | b1 | w2 | b2
W1_SIZE = IN_DIM * HID_DIM            # 50, w1[i, j] at i*HID_DIM + j
B1_OFF = W1_SIZE                      # 50
W2_OFF = B1_OFF + HID_DIM             # 55, w2[j, 0] at W2_OFF + j
B2_OFF = W2_OFF + HID_DIM * OUT_DIM   # 60
N_PARAMS = B2_OFF + OUT_DIM           # 61


def binary_nn_kernel(params_ref, x_ref, o_ref):
    # params_ref: (61,) f32 in SMEM (cheap scalar reads).
    # x_ref:      (IN_DIM, TB) f32 in VMEM -- batch on the lane axis.
    # o_ref:      (OUT_DIM, TB) f32 in VMEM -- lane-dense output slab.
    tb = x_ref.shape[1]

    # fc1 accumulators initialized with the bias (broadcast scalar -> lane slab).
    acc = [jnp.full((1, tb), params_ref[B1_OFF + j], dtype=jnp.float32)
           for j in range(HID_DIM)]

    # fc1: rows outer, hidden units inner -> each x row loaded from VMEM once,
    # only HID_DIM accumulators + one row live at a time (low vreg pressure).
    for i in range(IN_DIM):
        row = x_ref[pl.ds(i, 1), :]                      # (1, TB) lane-dense
        for j in range(HID_DIM):
            acc[j] = acc[j] + params_ref[i * HID_DIM + j] * row

    # ReLU + fc2: 5-term VPU MAC into a single output slab.
    y = jnp.full((1, tb), params_ref[B2_OFF], dtype=jnp.float32)
    for j in range(HID_DIM):
        y = y + params_ref[W2_OFF + j] * jnp.maximum(acc[j], 0.0)

    # Sigmoid: exp on EUP, exact reciprocal (keeps VALU free, full accuracy).
    e = jnp.exp(-y)
    o_ref[...] = pl.reciprocal(1.0 + e).astype(o_ref.dtype)


def binary_nn_forward(x, w1, b1, w2, b2, *, block_b=512):
    """x: (B, IN_DIM) f32 -> (B, OUT_DIM) f32. Matches BinaryNN.forward."""
    assert block_b % 128 == 0, "batch tile must be a multiple of 128 lanes"
    B = x.shape[0]

    # One packed parameter vector -> single SMEM-resident input.
    params = jnp.concatenate(
        [w1.reshape(-1), b1.reshape(-1), w2.reshape(-1), b2.reshape(-1)]
    ).astype(jnp.float32)
    assert params.shape[0] == N_PARAMS

    # Lane-dense layout: batch on the 128-lane axis; pad batch to a multiple
    # of the tile so last-dim blocks stay 128-aligned (unmasked stores).
    x_t = x.astype(jnp.float32).T                        # (IN_DIM, B)
    tb = min(block_b, pl.cdiv(B, 128) * 128)             # multiple of 128
    b_padded = pl.cdiv(B, tb) * tb
    if b_padded != B:
        x_t = jnp.pad(x_t, ((0, 0), (0, b_padded - B)))

    out_t = pl.pallas_call(
        binary_nn_kernel,
        out_shape=jax.ShapeDtypeStruct((OUT_DIM, b_padded), jnp.float32),
        grid=(b_padded // tb,),
        in_specs=[
            pl.BlockSpec(memory_space=pltpu.MemorySpace.SMEM),   # packed params
            pl.BlockSpec((IN_DIM, tb), lambda i: (0, i)),        # x tile
        ],
        out_specs=pl.BlockSpec((OUT_DIM, tb), lambda i: (0, i)),
        compiler_params=pltpu.CompilerParams(
            dimension_semantics=("parallel",),   # megacore-shardable batch axis
        ),
    )(params, x_t)

    return out_t[:, :B].T                                # (B, OUT_DIM)


def reference_forward(x, w1, b1, w2, b2):
    h = jnp.maximum(x @ w1 + b1, 0.0)
    return jax.nn.sigmoid(h @ w2 + b2)


if __name__ == "__main__":
    key = jax.random.PRNGKey(0)
    k_x, k_w1, k_b1, k_w2, k_b2, k_x2 = jax.random.split(key, 6)

    # nn.Linear-style uniform(-1/sqrt(fan_in), 1/sqrt(fan_in)) init.
    bound1 = 1.0 / jnp.sqrt(IN_DIM)
    w1 = jax.random.uniform(k_w1, (IN_DIM, HID_DIM), minval=-bound1, maxval=bound1, dtype=jnp.float32)
    b1 = jax.random.uniform(k_b1, (HID_DIM,), minval=-bound1, maxval=bound1, dtype=jnp.float32)
    bound2 = 1.0 / jnp.sqrt(HID_DIM)
    w2 = jax.random.uniform(k_w2, (HID_DIM, OUT_DIM), minval=-bound2, maxval=bound2, dtype=jnp.float32)
    b2 = jax.random.uniform(k_b2, (OUT_DIM,), minval=-bound2, maxval=bound2, dtype=jnp.float32)

    # Small batch, single grid step (padded to 128 lanes).
    B = 8
    x = jax.random.normal(k_x, (B, IN_DIM), dtype=jnp.float32)
    out = jax.block_until_ready(binary_nn_forward(x, w1, b1, w2, b2))
    ref = reference_forward(x, w1, b1, w2, b2)
    assert out.shape == (B, OUT_DIM)
    assert jnp.allclose(out, ref, atol=1e-5, rtol=1e-5), "mismatch vs reference (B=8)"

    # Non-multiple-of-128 batch with a multi-step (pipelined) grid + padding.
    B2 = 300
    x2 = jax.random.normal(k_x2, (B2, IN_DIM), dtype=jnp.float32)
    out2 = jax.block_until_ready(binary_nn_forward(x2, w1, b1, w2, b2, block_b=128))
    ref2 = reference_forward(x2, w1, b1, w2, b2)
    assert out2.shape == (B2, OUT_DIM)
    assert jnp.allclose(out2, ref2, atol=1e-5, rtol=1e-5), "mismatch vs reference (B=300)"

    print("KERNEL_OK")
</pallas_src>

<mosaic_0001>
module attributes {stable_mosaic.version = 11 : i64} {
  func.func @binary_nn_kernel(%arg0: i32, %arg1: memref<61xf32, #tpu.memory_space<smem>>, %arg2: memref<10x128xf32, #tpu.memory_space<vmem>>, %arg3: memref<1x128xf32, #tpu.memory_space<vmem>>) attributes {dimension_semantics = [#tpu.dimension_semantics<parallel>], iteration_bounds = array<i64: 1>, scalar_prefetch = 0 : i64, scratch_operands = 0 : i64, tpu.core_type = #tpu.core_type<tc>, window_params = [{transform_indices = @transform_0, window_bounds = array<i64: 61>}, {transform_indices = @transform_1, window_bounds = array<i64: 10, 128>}, {transform_indices = @transform_2, window_bounds = array<i64: 1, 128>}]} {
    %c50 = arith.constant 50 : index
    %0 = memref.load %arg1[%c50] : memref<61xf32, #tpu.memory_space<smem>>
    %1 = vector.broadcast %0 : f32 to vector<1x128xf32>
    %c51 = arith.constant 51 : index
    %2 = memref.load %arg1[%c51] : memref<61xf32, #tpu.memory_space<smem>>
    %3 = vector.broadcast %2 : f32 to vector<1x128xf32>
    %c52 = arith.constant 52 : index
    %4 = memref.load %arg1[%c52] : memref<61xf32, #tpu.memory_space<smem>>
    %5 = vector.broadcast %4 : f32 to vector<1x128xf32>
    %c53 = arith.constant 53 : index
    %6 = memref.load %arg1[%c53] : memref<61xf32, #tpu.memory_space<smem>>
    %7 = vector.broadcast %6 : f32 to vector<1x128xf32>
    %c54 = arith.constant 54 : index
    %8 = memref.load %arg1[%c54] : memref<61xf32, #tpu.memory_space<smem>>
    %9 = vector.broadcast %8 : f32 to vector<1x128xf32>
    %c0 = arith.constant 0 : index
    %c0_0 = arith.constant 0 : index
    %10 = vector.load %arg2[%c0, %c0_0] : memref<10x128xf32, #tpu.memory_space<vmem>>, vector<1x128xf32>
    %c0_1 = arith.constant 0 : index
    %11 = memref.load %arg1[%c0_1] : memref<61xf32, #tpu.memory_space<smem>>
    %12 = vector.broadcast %11 : f32 to vector<1x128xf32>
    %13 = arith.mulf %12, %10 : vector<1x128xf32>
    %14 = arith.addf %1, %13 : vector<1x128xf32>
    %c1 = arith.constant 1 : index
    %15 = memref.load %arg1[%c1] : memref<61xf32, #tpu.memory_space<smem>>
    %16 = vector.broadcast %15 : f32 to vector<1x128xf32>
    %17 = arith.mulf %16, %10 : vector<1x128xf32>
    %18 = arith.addf %3, %17 : vector<1x128xf32>
    %c2 = arith.constant 2 : index
    %19 = memref.load %arg1[%c2] : memref<61xf32, #tpu.memory_space<smem>>
    %20 = vector.broadcast %19 : f32 to vector<1x128xf32>
    %21 = arith.mulf %20, %10 : vector<1x128xf32>
    %22 = arith.addf %5, %21 : vector<1x128xf32>
    %c3 = arith.constant 3 : index
    %23 = memref.load %arg1[%c3] : memref<61xf32, #tpu.memory_space<smem>>
    %24 = vector.broadcast %23 : f32 to vector<1x128xf32>
    %25 = arith.mulf %24, %10 : vector<1x128xf32>
    %26 = arith.addf %7, %25 : vector<1x128xf32>
    %c4 = arith.constant 4 : index
    %27 = memref.load %arg1[%c4] : memref<61xf32, #tpu.memory_space<smem>>
    %28 = vector.broadcast %27 : f32 to vector<1x128xf32>
    %29 = arith.mulf %28, %10 : vector<1x128xf32>
    %30 = arith.addf %9, %29 : vector<1x128xf32>
    %c1_2 = arith.constant 1 : index
    %c0_3 = arith.constant 0 : index
    %31 = vector.load %arg2[%c1_2, %c0_3] : memref<10x128xf32, #tpu.memory_space<vmem>>, vector<1x128xf32>
    %c5 = arith.constant 5 : index
    %32 = memref.load %arg1[%c5] : memref<61xf32, #tpu.memory_space<smem>>
    %33 = vector.broadcast %32 : f32 to vector<1x128xf32>
    %34 = arith.mulf %33, %31 : vector<1x128xf32>
    %35 = arith.addf %14, %34 : vector<1x128xf32>
    %c6 = arith.constant 6 : index
    %36 = memref.load %arg1[%c6] : memref<61xf32, #tpu.memory_space<smem>>
    %37 = vector.broadcast %36 : f32 to vector<1x128xf32>
    %38 = arith.mulf %37, %31 : vector<1x128xf32>
    %39 = arith.addf %18, %38 : vector<1x128xf32>
    %c7 = arith.constant 7 : index
    %40 = memref.load %arg1[%c7] : memref<61xf32, #tpu.memory_space<smem>>
    %41 = vector.broadcast %40 : f32 to vector<1x128xf32>
    %42 = arith.mulf %41, %31 : vector<1x128xf32>
    %43 = arith.addf %22, %42 : vector<1x128xf32>
    %c8 = arith.constant 8 : index
    %44 = memref.load %arg1[%c8] : memref<61xf32, #tpu.memory_space<smem>>
    %45 = vector.broadcast %44 : f32 to vector<1x128xf32>
    %46 = arith.mulf %45, %31 : vector<1x128xf32>
    %47 = arith.addf %26, %46 : vector<1x128xf32>
    %c9 = arith.constant 9 : index
    %48 = memref.load %arg1[%c9] : memref<61xf32, #tpu.memory_space<smem>>
    %49 = vector.broadcast %48 : f32 to vector<1x128xf32>
    %50 = arith.mulf %49, %31 : vector<1x128xf32>
    %51 = arith.addf %30, %50 : vector<1x128xf32>
    %c2_4 = arith.constant 2 : index
    %c0_5 = arith.constant 0 : index
    %52 = vector.load %arg2[%c2_4, %c0_5] : memref<10x128xf32, #tpu.memory_space<vmem>>, vector<1x128xf32>
    %c10 = arith.constant 10 : index
    %53 = memref.load %arg1[%c10] : memref<61xf32, #tpu.memory_space<smem>>
    %54 = vector.broadcast %53 : f32 to vector<1x128xf32>
    %55 = arith.mulf %54, %52 : vector<1x128xf32>
    %56 = arith.addf %35, %55 : vector<1x128xf32>
    %c11 = arith.constant 11 : index
    %57 = memref.load %arg1[%c11] : memref<61xf32, #tpu.memory_space<smem>>
    %58 = vector.broadcast %57 : f32 to vector<1x128xf32>
    %59 = arith.mulf %58, %52 : vector<1x128xf32>
    %60 = arith.addf %39, %59 : vector<1x128xf32>
    %c12 = arith.constant 12 : index
    %61 = memref.load %arg1[%c12] : memref<61xf32, #tpu.memory_space<smem>>
    %62 = vector.broadcast %61 : f32 to vector<1x128xf32>
    %63 = arith.mulf %62, %52 : vector<1x128xf32>
    %64 = arith.addf %43, %63 : vector<1x128xf32>
    %c13 = arith.constant 13 : index
    %65 = memref.load %arg1[%c13] : memref<61xf32, #tpu.memory_space<smem>>
    %66 = vector.broadcast %65 : f32 to vector<1x128xf32>
    %67 = arith.mulf %66, %52 : vector<1x128xf32>
    %68 = arith.addf %47, %67 : vector<1x128xf32>
    %c14 = arith.constant 14 : index
    %69 = memref.load %arg1[%c14] : memref<61xf32, #tpu.memory_space<smem>>
    %70 = vector.broadcast %69 : f32 to vector<1x128xf32>
    %71 = arith.mulf %70, %52 : vector<1x128xf32>
    %72 = arith.addf %51, %71 : vector<1x128xf32>
    %c3_6 = arith.constant 3 : index
    %c0_7 = arith.constant 0 : index
    %73 = vector.load %arg2[%c3_6, %c0_7] : memref<10x128xf32, #tpu.memory_space<vmem>>, vector<1x128xf32>
    %c15 = arith.constant 15 : index
    %74 = memref.load %arg1[%c15] : memref<61xf32, #tpu.memory_space<smem>>
    %75 = vector.broadcast %74 : f32 to vector<1x128xf32>
    %76 = arith.mulf %75, %73 : vector<1x128xf32>
    %77 = arith.addf %56, %76 : vector<1x128xf32>
    %c16 = arith.constant 16 : index
    %78 = memref.load %arg1[%c16] : memref<61xf32, #tpu.memory_space<smem>>
    %79 = vector.broadcast %78 : f32 to vector<1x128xf32>
    %80 = arith.mulf %79, %73 : vector<1x128xf32>
    %81 = arith.addf %60, %80 : vector<1x128xf32>
    %c17 = arith.constant 17 : index
    %82 = memref.load %arg1[%c17] : memref<61xf32, #tpu.memory_space<smem>>
    %83 = vector.broadcast %82 : f32 to vector<1x128xf32>
    %84 = arith.mulf %83, %73 : vector<1x128xf32>
    %85 = arith.addf %64, %84 : vector<1x128xf32>
    %c18 = arith.constant 18 : index
    %86 = memref.load %arg1[%c18] : memref<61xf32, #tpu.memory_space<smem>>
    %87 = vector.broadcast %86 : f32 to vector<1x128xf32>
    %88 = arith.mulf %87, %73 : vector<1x128xf32>
    %89 = arith.addf %68, %88 : vector<1x128xf32>
    %c19 = arith.constant 19 : index
    %90 = memref.load %arg1[%c19] : memref<61xf32, #tpu.memory_space<smem>>
    %91 = vector.broadcast %90 : f32 to vector<1x128xf32>
    %92 = arith.mulf %91, %73 : vector<1x128xf32>
    %93 = arith.addf %72, %92 : vector<1x128xf32>
    %c4_8 = arith.constant 4 : index
    %c0_9 = arith.constant 0 : index
    %94 = vector.load %arg2[%c4_8, %c0_9] : memref<10x128xf32, #tpu.memory_space<vmem>>, vector<1x128xf32>
    %c20 = arith.constant 20 : index
    %95 = memref.load %arg1[%c20] : memref<61xf32, #tpu.memory_space<smem>>
    %96 = vector.broadcast %95 : f32 to vector<1x128xf32>
    %97 = arith.mulf %96, %94 : vector<1x128xf32>
    %98 = arith.addf %77, %97 : vector<1x128xf32>
    %c21 = arith.constant 21 : index
    %99 = memref.load %arg1[%c21] : memref<61xf32, #tpu.memory_space<smem>>
    %100 = vector.broadcast %99 : f32 to vector<1x128xf32>
    %101 = arith.mulf %100, %94 : vector<1x128xf32>
    %102 = arith.addf %81, %101 : vector<1x128xf32>
    %c22 = arith.constant 22 : index
    %103 = memref.load %arg1[%c22] : memref<61xf32, #tpu.memory_space<smem>>
    %104 = vector.broadcast %103 : f32 to vector<1x128xf32>
    %105 = arith.mulf %104, %94 : vector<1x128xf32>
    %106 = arith.addf %85, %105 : vector<1x128xf32>
    %c23 = arith.constant 23 : index
    %107 = memref.load %arg1[%c23] : memref<61xf32, #tpu.memory_space<smem>>
    %108 = vector.broadcast %107 : f32 to vector<1x128xf32>
    %109 = arith.mulf %108, %94 : vector<1x128xf32>
    %110 = arith.addf %89, %109 : vector<1x128xf32>
    %c24 = arith.constant 24 : index
    %111 = memref.load %arg1[%c24] : memref<61xf32, #tpu.memory_space<smem>>
    %112 = vector.broadcast %111 : f32 to vector<1x128xf32>
    %113 = arith.mulf %112, %94 : vector<1x128xf32>
    %114 = arith.addf %93, %113 : vector<1x128xf32>
    %c5_10 = arith.constant 5 : index
    %c0_11 = arith.constant 0 : index
    %115 = vector.load %arg2[%c5_10, %c0_11] : memref<10x128xf32, #tpu.memory_space<vmem>>, vector<1x128xf32>
    %c25 = arith.constant 25 : index
    %116 = memref.load %arg1[%c25] : memref<61xf32, #tpu.memory_space<smem>>
    %117 = vector.broadcast %116 : f32 to vector<1x128xf32>
    %118 = arith.mulf %117, %115 : vector<1x128xf32>
    %119 = arith.addf %98, %118 : vector<1x128xf32>
    %c26 = arith.constant 26 : index
    %120 = memref.load %arg1[%c26] : memref<61xf32, #tpu.memory_space<smem>>
    %121 = vector.broadcast %120 : f32 to vector<1x128xf32>
    %122 = arith.mulf %121, %115 : vector<1x128xf32>
    %123 = arith.addf %102, %122 : vector<1x128xf32>
    %c27 = arith.constant 27 : index
    %124 = memref.load %arg1[%c27] : memref<61xf32, #tpu.memory_space<smem>>
    %125 = vector.broadcast %124 : f32 to vector<1x128xf32>
    %126 = arith.mulf %125, %115 : vector<1x128xf32>
    %127 = arith.addf %106, %126 : vector<1x128xf32>
    %c28 = arith.constant 28 : index
    %128 = memref.load %arg1[%c28] : memref<61xf32, #tpu.memory_space<smem>>
    %129 = vector.broadcast %128 : f32 to vector<1x128xf32>
    %130 = arith.mulf %129, %115 : vector<1x128xf32>
    %131 = arith.addf %110, %130 : vector<1x128xf32>
    %c29 = arith.constant 29 : index
    %132 = memref.load %arg1[%c29] : memref<61xf32, #tpu.memory_space<smem>>
    %133 = vector.broadcast %132 : f32 to vector<1x128xf32>
    %134 = arith.mulf %133, %115 : vector<1x128xf32>
    %135 = arith.addf %114, %134 : vector<1x128xf32>
    %c6_12 = arith.constant 6 : index
    %c0_13 = arith.constant 0 : index
    %136 = vector.load %arg2[%c6_12, %c0_13] : memref<10x128xf32, #tpu.memory_space<vmem>>, vector<1x128xf32>
    %c30 = arith.constant 30 : index
    %137 = memref.load %arg1[%c30] : memref<61xf32, #tpu.memory_space<smem>>
    %138 = vector.broadcast %137 : f32 to vector<1x128xf32>
    %139 = arith.mulf %138, %136 : vector<1x128xf32>
    %140 = arith.addf %119, %139 : vector<1x128xf32>
    %c31 = arith.constant 31 : index
    %141 = memref.load %arg1[%c31] : memref<61xf32, #tpu.memory_space<smem>>
    %142 = vector.broadcast %141 : f32 to vector<1x128xf32>
    %143 = arith.mulf %142, %136 : vector<1x128xf32>
    %144 = arith.addf %123, %143 : vector<1x128xf32>
    %c32 = arith.constant 32 : index
    %145 = memref.load %arg1[%c32] : memref<61xf32, #tpu.memory_space<smem>>
    %146 = vector.broadcast %145 : f32 to vector<1x128xf32>
    %147 = arith.mulf %146, %136 : vector<1x128xf32>
    %148 = arith.addf %127, %147 : vector<1x128xf32>
    %c33 = arith.constant 33 : index
    %149 = memref.load %arg1[%c33] : memref<61xf32, #tpu.memory_space<smem>>
    %150 = vector.broadcast %149 : f32 to vector<1x128xf32>
    %151 = arith.mulf %150, %136 : vector<1x128xf32>
    %152 = arith.addf %131, %151 : vector<1x128xf32>
    %c34 = arith.constant 34 : index
    %153 = memref.load %arg1[%c34] : memref<61xf32, #tpu.memory_space<smem>>
    %154 = vector.broadcast %153 : f32 to vector<1x128xf32>
    %155 = arith.mulf %154, %136 : vector<1x128xf32>
    %156 = arith.addf %135, %155 : vector<1x128xf32>
    %c7_14 = arith.constant 7 : index
    %c0_15 = arith.constant 0 : index
    %157 = vector.load %arg2[%c7_14, %c0_15] : memref<10x128xf32, #tpu.memory_space<vmem>>, vector<1x128xf32>
    %c35 = arith.constant 35 : index
    %158 = memref.load %arg1[%c35] : memref<61xf32, #tpu.memory_space<smem>>
    %159 = vector.broadcast %158 : f32 to vector<1x128xf32>
    %160 = arith.mulf %159, %157 : vector<1x128xf32>
    %161 = arith.addf %140, %160 : vector<1x128xf32>
    %c36 = arith.constant 36 : index
    %162 = memref.load %arg1[%c36] : memref<61xf32, #tpu.memory_space<smem>>
    %163 = vector.broadcast %162 : f32 to vector<1x128xf32>
    %164 = arith.mulf %163, %157 : vector<1x128xf32>
    %165 = arith.addf %144, %164 : vector<1x128xf32>
    %c37 = arith.constant 37 : index
    %166 = memref.load %arg1[%c37] : memref<61xf32, #tpu.memory_space<smem>>
    %167 = vector.broadcast %166 : f32 to vector<1x128xf32>
    %168 = arith.mulf %167, %157 : vector<1x128xf32>
    %169 = arith.addf %148, %168 : vector<1x128xf32>
    %c38 = arith.constant 38 : index
    %170 = memref.load %arg1[%c38] : memref<61xf32, #tpu.memory_space<smem>>
    %171 = vector.broadcast %170 : f32 to vector<1x128xf32>
    %172 = arith.mulf %171, %157 : vector<1x128xf32>
    %173 = arith.addf %152, %172 : vector<1x128xf32>
    %c39 = arith.constant 39 : index
    %174 = memref.load %arg1[%c39] : memref<61xf32, #tpu.memory_space<smem>>
    %175 = vector.broadcast %174 : f32 to vector<1x128xf32>
    %176 = arith.mulf %175, %157 : vector<1x128xf32>
    %177 = arith.addf %156, %176 : vector<1x128xf32>
    %c8_16 = arith.constant 8 : index
    %c0_17 = arith.constant 0 : index
    %178 = vector.load %arg2[%c8_16, %c0_17] : memref<10x128xf32, #tpu.memory_space<vmem>>, vector<1x128xf32>
    %c40 = arith.constant 40 : index
    %179 = memref.load %arg1[%c40] : memref<61xf32, #tpu.memory_space<smem>>
    %180 = vector.broadcast %179 : f32 to vector<1x128xf32>
    %181 = arith.mulf %180, %178 : vector<1x128xf32>
    %182 = arith.addf %161, %181 : vector<1x128xf32>
    %c41 = arith.constant 41 : index
    %183 = memref.load %arg1[%c41] : memref<61xf32, #tpu.memory_space<smem>>
    %184 = vector.broadcast %183 : f32 to vector<1x128xf32>
    %185 = arith.mulf %184, %178 : vector<1x128xf32>
    %186 = arith.addf %165, %185 : vector<1x128xf32>
    %c42 = arith.constant 42 : index
    %187 = memref.load %arg1[%c42] : memref<61xf32, #tpu.memory_space<smem>>
    %188 = vector.broadcast %187 : f32 to vector<1x128xf32>
    %189 = arith.mulf %188, %178 : vector<1x128xf32>
    %190 = arith.addf %169, %189 : vector<1x128xf32>
    %c43 = arith.constant 43 : index
    %191 = memref.load %arg1[%c43] : memref<61xf32, #tpu.memory_space<smem>>
    %192 = vector.broadcast %191 : f32 to vector<1x128xf32>
    %193 = arith.mulf %192, %178 : vector<1x128xf32>
    %194 = arith.addf %173, %193 : vector<1x128xf32>
    %c44 = arith.constant 44 : index
    %195 = memref.load %arg1[%c44] : memref<61xf32, #tpu.memory_space<smem>>
    %196 = vector.broadcast %195 : f32 to vector<1x128xf32>
    %197 = arith.mulf %196, %178 : vector<1x128xf32>
    %198 = arith.addf %177, %197 : vector<1x128xf32>
    %c9_18 = arith.constant 9 : index
    %c0_19 = arith.constant 0 : index
    %199 = vector.load %arg2[%c9_18, %c0_19] : memref<10x128xf32, #tpu.memory_space<vmem>>, vector<1x128xf32>
    %c45 = arith.constant 45 : index
    %200 = memref.load %arg1[%c45] : memref<61xf32, #tpu.memory_space<smem>>
    %201 = vector.broadcast %200 : f32 to vector<1x128xf32>
    %202 = arith.mulf %201, %199 : vector<1x128xf32>
    %203 = arith.addf %182, %202 : vector<1x128xf32>
    %c46 = arith.constant 46 : index
    %204 = memref.load %arg1[%c46] : memref<61xf32, #tpu.memory_space<smem>>
    %205 = vector.broadcast %204 : f32 to vector<1x128xf32>
    %206 = arith.mulf %205, %199 : vector<1x128xf32>
    %207 = arith.addf %186, %206 : vector<1x128xf32>
    %c47 = arith.constant 47 : index
    %208 = memref.load %arg1[%c47] : memref<61xf32, #tpu.memory_space<smem>>
    %209 = vector.broadcast %208 : f32 to vector<1x128xf32>
    %210 = arith.mulf %209, %199 : vector<1x128xf32>
    %211 = arith.addf %190, %210 : vector<1x128xf32>
    %c48 = arith.constant 48 : index
    %212 = memref.load %arg1[%c48] : memref<61xf32, #tpu.memory_space<smem>>
    %213 = vector.broadcast %212 : f32 to vector<1x128xf32>
    %214 = arith.mulf %213, %199 : vector<1x128xf32>
    %215 = arith.addf %194, %214 : vector<1x128xf32>
    %c49 = arith.constant 49 : index
    %216 = memref.load %arg1[%c49] : memref<61xf32, #tpu.memory_space<smem>>
    %217 = vector.broadcast %216 : f32 to vector<1x128xf32>
    %218 = arith.mulf %217, %199 : vector<1x128xf32>
    %219 = arith.addf %198, %218 : vector<1x128xf32>
    %c60 = arith.constant 60 : index
    %220 = memref.load %arg1[%c60] : memref<61xf32, #tpu.memory_space<smem>>
    %221 = vector.broadcast %220 : f32 to vector<1x128xf32>
    %c55 = arith.constant 55 : index
    %222 = memref.load %arg1[%c55] : memref<61xf32, #tpu.memory_space<smem>>
    %cst = arith.constant 0.000000e+00 : f32
    %223 = vector.broadcast %cst : f32 to vector<1x128xf32>
    %224 = arith.maximumf %203, %223 : vector<1x128xf32>
    %225 = vector.broadcast %222 : f32 to vector<1x128xf32>
    %226 = arith.mulf %225, %224 : vector<1x128xf32>
    %227 = arith.addf %221, %226 : vector<1x128xf32>
    %c56 = arith.constant 56 : index
    %228 = memref.load %arg1[%c56] : memref<61xf32, #tpu.memory_space<smem>>
    %cst_20 = arith.constant 0.000000e+00 : f32
    %229 = vector.broadcast %cst_20 : f32 to vector<1x128xf32>
    %230 = arith.maximumf %207, %229 : vector<1x128xf32>
    %231 = vector.broadcast %228 : f32 to vector<1x128xf32>
    %232 = arith.mulf %231, %230 : vector<1x128xf32>
    %233 = arith.addf %227, %232 : vector<1x128xf32>
    %c57 = arith.constant 57 : index
    %234 = memref.load %arg1[%c57] : memref<61xf32, #tpu.memory_space<smem>>
    %cst_21 = arith.constant 0.000000e+00 : f32
    %235 = vector.broadcast %cst_21 : f32 to vector<1x128xf32>
    %236 = arith.maximumf %211, %235 : vector<1x128xf32>
    %237 = vector.broadcast %234 : f32 to vector<1x128xf32>
    %238 = arith.mulf %237, %236 : vector<1x128xf32>
    %239 = arith.addf %233, %238 : vector<1x128xf32>
    %c58 = arith.constant 58 : index
    %240 = memref.load %arg1[%c58] : memref<61xf32, #tpu.memory_space<smem>>
    %cst_22 = arith.constant 0.000000e+00 : f32
    %241 = vector.broadcast %cst_22 : f32 to vector<1x128xf32>
    %242 = arith.maximumf %215, %241 : vector<1x128xf32>
    %243 = vector.broadcast %240 : f32 to vector<1x128xf32>
    %244 = arith.mulf %243, %242 : vector<1x128xf32>
    %245 = arith.addf %239, %244 : vector<1x128xf32>
    %c59 = arith.constant 59 : index
    %246 = memref.load %arg1[%c59] : memref<61xf32, #tpu.memory_space<smem>>
    %cst_23 = arith.constant 0.000000e+00 : f32
    %247 = vector.broadcast %cst_23 : f32 to vector<1x128xf32>
    %248 = arith.maximumf %219, %247 : vector<1x128xf32>
    %249 = vector.broadcast %246 : f32 to vector<1x128xf32>
    %250 = arith.mulf %249, %248 : vector<1x128xf32>
    %251 = arith.addf %245, %250 : vector<1x128xf32>
    %cst_24 = arith.constant 0.000000e+00 : f32
    %252 = vector.broadcast %cst_24 : f32 to vector<1x128xf32>
    %253 = arith.subf %252, %251 : vector<1x128xf32>
    %254 = math.exp %253 : vector<1x128xf32>
    %cst_25 = arith.constant 1.000000e+00 : f32
    %255 = vector.broadcast %cst_25 : f32 to vector<1x128xf32>
    %256 = arith.addf %255, %254 : vector<1x128xf32>
    %257 = tpu.reciprocal %256 : vector<1x128xf32> -> vector<1x128xf32>
    %c0_26 = arith.constant 0 : index
    %c0_27 = arith.constant 0 : index
    %258 = vector.load %arg3[%c0_26, %c0_27] : memref<1x128xf32, #tpu.memory_space<vmem>>, vector<1x128xf32>
    tpu.vector_store %arg3[%c0_26, %c0_27], %257 {strides = array<i32>} : memref<1x128xf32, #tpu.memory_space<vmem>>, vector<1x128xf32>,
    return
  }
  func.func @transform_0(%arg0: i32) -> i32 {
    %c0_i32 = arith.constant 0 : i32
    %c0_i32_0 = arith.constant 0 : i32
    return %c0_i32 : i32
  }
  func.func @transform_1(%arg0: i32) -> (i32, i32) {
    %c0_i32 = arith.constant 0 : i32
    %c0_i32_0 = arith.constant 0 : i32
    return %c0_i32, %arg0 : i32, i32
  }
  func.func @transform_2(%arg0: i32) -> (i32, i32) {
    %c0_i32 = arith.constant 0 : i32
    %c0_i32_0 = arith.constant 0 : i32
    return %c0_i32, %arg0 : i32, i32
  }
}

</mosaic_0001>

<bundles_post_ra>
// kernel: tpu_custom_call.1
= control target key start
LH: loop header
LB: loop body
LE: loop exit
PB: predicated region body
PF: predicated region fallthrough
CT: control target
= control target key end

     0   :  { %7 = vsyncpa [#allocation5], 0  ;;  %s603_s0 = inlined_call_operand.hbm [shape: f32[61], index: 0, kind: input, shape index: {}]   ;;  %s604_s1 = inlined_call_operand.hbm [shape: f32[10,128], index: 1, kind: input, shape index: {}]   ;;  %s605_s2 = inlined_call_operand.hbm [shape: f32[1,128], index: 2, kind: output, shape index: {}]  }
   0x1   :  { %8 = vsyncpa [#allocation3], 0 }
   0x2   :  { %9 = vsyncpa [#allocation4], 0  ;;  %s15_s11 = sshll.u32 %s603_s0, 4  ;;  %s23_s14 = sshll.u32 %s604_s1, 4  ;;  %s16_s11 = int_to_ptr.hbm [resolvable:$true] %s15_s11  ;;  %s24_s14 = int_to_ptr.hbm [resolvable:$true] %s23_s14 }
   0x3   :  { %s460_s15 = smov [#allocation2]   ;;  %s461_s16 = smov [#allocation6]  }
   0x4   :  { %18 = dma.hbm_to_smem %s16_s11, 16, %s460_s15, [#allocation5]  }
   0x5   :  { %s25_s17 = sshll.u32 %s461_s16, 4  ;;  %s462_s18 = smov 128   ;;  %s26_s17 = int_to_ptr.vmem [resolvable:$true] %s25_s17 }
   0x6   :  { %s463_s19 = smov 8  }
   0x7   :  { %31 = dma.hbm_to_vmem [thread:$0]  %s24_s14, 256, %s26_s17, [#allocation3], %s462_s18, %s462_s18, %s463_s19  }
   0x8   :  { %454 = dma.done.wait [#allocation5], 16  }
   0x9   :  { %455 = vsyncadd [#allocation5], 4294967280 }
   0xa   :  { %456 = dma.done.wait [#allocation3], 256  }
   0xb   :  { %457 = vsyncadd [#allocation3], 4294967040 }
   0xc   :  { %40 = sfence }
   0xd   :  { %s486_s0 = sld [smem:[#allocation2 + $0x32]]  ;;  %v51_v0 = vld [vmem:[#allocation6] sm:$0x1]  ;;  %v72_v9 = vld [vmem:[#allocation6 + $0x1] sm:$0x1] }
   0xe   :  { %s488_s20 = sld [smem:[#allocation2 + $0x33]]  ;;  %v93_v28 = vld [vmem:[#allocation6 + $0x2] sm:$0x1]  ;;  %v114_v44 = vld [vmem:[#allocation6 + $0x3] sm:$0x1] }
   0xf   :  { %s490_s21 = sld [smem:[#allocation2 + $0x34]]  ;;  %v135_v60 = vld [vmem:[#allocation6 + $0x4] sm:$0x1] }
  0x10   :  { %s492_s1 = sld [smem:[#allocation2 + $0x35]] }
  0x11   :  { %s494_s22 = sld [smem:[#allocation2 + $0x36]] }
  0x12   :  { %s52_s23 = sld [smem:[#allocation2]] }
  0x13   :  { %s330_s24 = sld [smem:[#allocation2 + $0x1]]  ;;  %v42_v6 = vstv %s486_s0 }
  0x14   :  { %s331_s25 = sld [smem:[#allocation2 + $0x2]]  ;;  %v44_v11 = vstv %s488_s20 }
  0x15   :  { %s332_s26 = sld [smem:[#allocation2 + $0x3]]  ;;  %v46_v14 = vstv %s490_s21 }
  0x16   :  { %s496_s27 = sld [smem:[#allocation2 + $0x4]]  ;;  %v48_v15 = vstv %s492_s1 }
  0x17   :  { %s498_s28 = sld [smem:[#allocation2 + $0x5]]  ;;  %v50_v22 = vstv %s494_s22 }
  0x18   :  { %s500_s29 = sld [smem:[#allocation2 + $0x6]]  ;;  %v53_v1 = vstv %s52_s23 }
  0x19   :  { %s502_s30 = sld [smem:[#allocation2 + $0x7]]  ;;  %v57_v2 = vstv %s330_s24  ;;  %v54_v4 = vmul.f32 %v53_v1, %v51_v0 }
  0x1a   :  { %s504_s3 = sld [smem:[#allocation2 + $0x8]]  ;;  %v61_v3 = vstv %s331_s25  ;;  %v58_v7 = vmul.f32 %v57_v2, %v51_v0 }
  0x1b   :  { %s506_s4 = sld [smem:[#allocation2 + $0x9]]  ;;  %v65_v5 = vstv %s332_s26  ;;  %v62_v12 = vmul.f32 %v61_v3, %v51_v0  ;;  %v55_v18 = vadd.f32 %v54_v4, %v42_v6 }
  0x1c   :  { %s508_s5 = sld [smem:[#allocation2 + $0xa]]  ;;  %v69_v8 = vstv %s496_s27  ;;  %v66_v16 = vmul.f32 %v65_v5, %v51_v0  ;;  %v59_v23 = vadd.f32 %v58_v7, %v44_v11  ;;  %v156_v11 = vld [vmem:[#allocation6 + $0x5] sm:$0x1] }
  0x1d   :  { %s510_s6 = sld [smem:[#allocation2 + $0xb]]  ;;  %v74_v10 = vstv %s498_s28  ;;  %v70_v19 = vmul.f32 %v69_v8, %v51_v0  ;;  %v63_v26 = vadd.f32 %v62_v12, %v46_v14 }
  0x1e   :  { %s512_s7 = sld [smem:[#allocation2 + $0xc]]  ;;  %v78_v13 = vstv %s500_s29  ;;  %v75_v20 = vmul.f32 %v74_v10, %v72_v9  ;;  %v67_v31 = vadd.f32 %v66_v16, %v48_v15 }
  0x1f   :  { %s514_s8 = sld [smem:[#allocation2 + $0xd]]  ;;  %v82_v17 = vstv %s502_s30  ;;  %v79_v24 = vmul.f32 %v78_v13, %v72_v9  ;;  %v71_v34 = vadd.f32 %v70_v19, %v50_v22 }
  0x20   :  { %s519_s9 = sld [smem:[#allocation2 + $0xe]]  ;;  %v86_v21 = vstv %s504_s3  ;;  %v83_v27 = vmul.f32 %v82_v17, %v72_v9  ;;  %v76_v35 = vadd.f32 %v75_v20, %v55_v18 }
  0x21   :  { %s523_s10 = sld [smem:[#allocation2 + $0xf]]  ;;  %v90_v25 = vstv %s506_s4  ;;  %v87_v32 = vmul.f32 %v86_v21, %v72_v9  ;;  %v80_v38 = vadd.f32 %v79_v24, %v59_v23 }
  0x22   :  { %s528_s11 = sld [smem:[#allocation2 + $0x10]]  ;;  %v95_v29 = vstv %s508_s5  ;;  %v91_v36 = vmul.f32 %v90_v25, %v72_v9  ;;  %v84_v42 = vadd.f32 %v83_v27, %v63_v26  ;;  %v177_v26 = vld [vmem:[#allocation6 + $0x6] sm:$0x1] }
  0x23   :  { %s531_s12 = sld [smem:[#allocation2 + $0x11]]  ;;  %v99_v30 = vstv %s510_s6  ;;  %v96_v39 = vmul.f32 %v95_v29, %v93_v28  ;;  %v88_v46 = vadd.f32 %v87_v32, %v67_v31 }
  0x24   :  { %s535_s13 = sld [smem:[#allocation2 + $0x12]]  ;;  %v103_v33 = vstv %s512_s7  ;;  %v100_v40 = vmul.f32 %v99_v30, %v93_v28  ;;  %v92_v50 = vadd.f32 %v91_v36, %v71_v34 }
  0x25   :  { %s539_s14 = sld [smem:[#allocation2 + $0x13]]  ;;  %v107_v37 = vstv %s514_s8  ;;  %v104_v43 = vmul.f32 %v103_v33, %v93_v28  ;;  %v97_v53 = vadd.f32 %v96_v39, %v76_v35 }
  0x26   :  { %s542_s15 = sld [smem:[#allocation2 + $0x14]]  ;;  %v111_v41 = vstv %s519_s9  ;;  %v108_v47 = vmul.f32 %v107_v37, %v93_v28  ;;  %v101_v54 = vadd.f32 %v100_v40, %v80_v38 }
  0x27   :  { %s545_s16 = sld [smem:[#allocation2 + $0x15]]  ;;  %v116_v45 = vstv %s523_s10  ;;  %v112_v51 = vmul.f32 %v111_v41, %v93_v28  ;;  %v105_v57 = vadd.f32 %v104_v43, %v84_v42  ;;  %v198_v41 = vld [vmem:[#allocation6 + $0x7] sm:$0x1] }
  0x28   :  { %s548_s17 = sld [smem:[#allocation2 + $0x16]]  ;;  %v120_v48 = vstv %s528_s11  ;;  %v117_v55 = vmul.f32 %v116_v45, %v114_v44  ;;  %v109_v62 = vadd.f32 %v108_v47, %v88_v46 }
  0x29   :  { %s551_s18 = sld [smem:[#allocation2 + $0x17]]  ;;  %v124_v49 = vstv %s531_s12  ;;  %v121_v58 = vmul.f32 %v120_v48, %v114_v44  ;;  %v113_v1 = vadd.f32 %v112_v51, %v92_v50 }
  0x2a   :  { %s555_s19 = sld [smem:[#allocation2 + $0x18]]  ;;  %v128_v52 = vstv %s535_s13  ;;  %v125_v59 = vmul.f32 %v124_v49, %v114_v44  ;;  %v118_v5 = vadd.f32 %v117_v55, %v97_v53 }
  0x2b   :  { %s558_s0 = sld [smem:[#allocation2 + $0x19]]  ;;  %v132_v56 = vstv %s539_s14  ;;  %v129_v63 = vmul.f32 %v128_v52, %v114_v44  ;;  %v122_v8 = vadd.f32 %v121_v58, %v101_v54 }
  0x2c   :  { %s561_s20 = sld [smem:[#allocation2 + $0x1a]]  ;;  %v137_v61 = vstv %s542_s15  ;;  %v133_v2 = vmul.f32 %v132_v56, %v114_v44  ;;  %v126_v9 = vadd.f32 %v125_v59, %v105_v57  ;;  %v219_v59 = vld [vmem:[#allocation6 + $0x8] sm:$0x1] }
  0x2d   :  { %s564_s21 = sld [smem:[#allocation2 + $0x1b]]  ;;  %v141_v0 = vstv %s545_s16  ;;  %v138_v6 = vmul.f32 %v137_v61, %v135_v60  ;;  %v130_v13 = vadd.f32 %v129_v63, %v109_v62 }
  0x2e   :  { %s567_s1 = sld [smem:[#allocation2 + $0x1c]]  ;;  %v145_v3 = vstv %s548_s17  ;;  %v142_v10 = vmul.f32 %v141_v0, %v135_v60  ;;  %v134_v17 = vadd.f32 %v133_v2, %v113_v1 }
  0x2f   :  { %v149_v4 = vstv %s551_s18  ;;  %s571_s22 = sld [smem:[#allocation2 + $0x1d]]  ;;  %v146_v14 = vmul.f32 %v145_v3, %v135_v60  ;;  %v139_v20 = vadd.f32 %v138_v6, %v118_v5 }
  0x30   :  { %v153_v7 = vstv %s555_s19  ;;  %s574_s23 = sld [smem:[#allocation2 + $0x1e]]  ;;  %v150_v15 = vmul.f32 %v149_v4, %v135_v60  ;;  %v143_v23 = vadd.f32 %v142_v10, %v122_v8 }
  0x31   :  { %v158_v12 = vstv %s558_s0  ;;  %s577_s24 = sld [smem:[#allocation2 + $0x1f]]  ;;  %v154_v18 = vmul.f32 %v153_v7, %v135_v60  ;;  %v147_v27 = vadd.f32 %v146_v14, %v126_v9 }
  0x32   :  { %v162_v16 = vstv %s561_s20  ;;  %s580_s25 = sld [smem:[#allocation2 + $0x20]]  ;;  %v159_v21 = vmul.f32 %v158_v12, %v156_v11  ;;  %v151_v28 = vadd.f32 %v150_v15, %v130_v13  ;;  %v240_v12 = vld [vmem:[#allocation6 + $0x9] sm:$0x1]  ;;  %s464_s20 = smov [#allocation7]  }
  0x33   :  { %v166_v19 = vstv %s564_s21  ;;  %s583_s26 = sld [smem:[#allocation2 + $0x21]]  ;;  %v163_v24 = vmul.f32 %v162_v16, %v156_v11  ;;  %v155_v31 = vadd.f32 %v154_v18, %v134_v17  ;;  %s312_s21 = sshll.u32 %s464_s20, 4  ;;  %s313_s21 = int_to_ptr.vmem [resolvable:$true] %s312_s21 }
  0x34   :  { %v170_v22 = vstv %s567_s1  ;;  %s586_s27 = sld [smem:[#allocation2 + $0x22]]  ;;  %v167_v29 = vmul.f32 %v166_v19, %v156_v11  ;;  %v160_v35 = vadd.f32 %v159_v21, %v139_v20 }
  0x35   :  { %v174_v25 = vstv %s571_s22  ;;  %s589_s28 = sld [smem:[#allocation2 + $0x23]]  ;;  %v171_v32 = vmul.f32 %v170_v22, %v156_v11  ;;  %v164_v38 = vadd.f32 %v163_v24, %v143_v23 }
  0x36   :  { %v179_v30 = vstv %s574_s23  ;;  %s365_s29 = sld [smem:[#allocation2 + $0x24]]  ;;  %v175_v33 = vmul.f32 %v174_v25, %v156_v11  ;;  %v168_v42 = vadd.f32 %v167_v29, %v147_v27  ;;  %s314_s23 = sshll.u32 %s605_s2, 4  ;;  %s315_s23 = int_to_ptr.hbm [resolvable:$true] %s314_s23 }
  0x37   :  { %v183_v34 = vstv %s577_s24  ;;  %s366_s30 = sld [smem:[#allocation2 + $0x25]]  ;;  %v180_v36 = vmul.f32 %v179_v30, %v177_v26  ;;  %v172_v45 = vadd.f32 %v171_v32, %v151_v28 }
  0x38   :  { %v187_v37 = vstv %s580_s25  ;;  %s367_s3 = sld [smem:[#allocation2 + $0x26]]  ;;  %v184_v39 = vmul.f32 %v183_v34, %v177_v26  ;;  %v176_v46 = vadd.f32 %v175_v33, %v155_v31 }
  0x39   :  { %v191_v40 = vstv %s583_s26  ;;  %s368_s4 = sld [smem:[#allocation2 + $0x27]]  ;;  %v188_v43 = vmul.f32 %v187_v37, %v177_v26  ;;  %v181_v49 = vadd.f32 %v180_v36, %v160_v35 }
  0x3a   :  { %v195_v44 = vstv %s586_s27  ;;  %s369_s5 = sld [smem:[#allocation2 + $0x28]]  ;;  %v192_v47 = vmul.f32 %v191_v40, %v177_v26  ;;  %v185_v53 = vadd.f32 %v184_v39, %v164_v38 }
  0x3b   :  { %v200_v48 = vstv %s589_s28  ;;  %s370_s6 = sld [smem:[#allocation2 + $0x29]]  ;;  %v196_v50 = vmul.f32 %v195_v44, %v177_v26  ;;  %v189_v56 = vadd.f32 %v188_v43, %v168_v42 }
  0x3c   :  { %v201_v51 = vmul.f32 %v200_v48, %v198_v41  ;;  %v204_v52 = vstv %s365_s29  ;;  %s371_s7 = sld [smem:[#allocation2 + $0x2a]]  ;;  %v193_v60 = vadd.f32 %v192_v47, %v172_v45 }
  0x3d   :  { %v205_v54 = vmul.f32 %v204_v52, %v198_v41  ;;  %v208_v55 = vstv %s366_s30  ;;  %s372_s8 = sld [smem:[#allocation2 + $0x2b]]  ;;  %v197_v63 = vadd.f32 %v196_v50, %v176_v46 }
  0x3e   :  { %v209_v57 = vmul.f32 %v208_v55, %v198_v41  ;;  %v212_v58 = vstv %s367_s3  ;;  %s373_s9 = sld [smem:[#allocation2 + $0x2c]]  ;;  %v202_v0 = vadd.f32 %v201_v51, %v181_v49 }
  0x3f   :  { %v213_v61 = vmul.f32 %v212_v58, %v198_v41  ;;  %v216_v62 = vstv %s368_s4  ;;  %s374_s10 = sld [smem:[#allocation2 + $0x2d]]  ;;  %v206_v3 = vadd.f32 %v205_v54, %v185_v53 }
  0x40   :  { %v217_v1 = vmul.f32 %v216_v62, %v198_v41  ;;  %v221_v2 = vstv %s369_s5  ;;  %s375_s11 = sld [smem:[#allocation2 + $0x2e]]  ;;  %v210_v6 = vadd.f32 %v209_v57, %v189_v56 }
  0x41   :  { %v222_v4 = vmul.f32 %v221_v2, %v219_v59  ;;  %v225_v5 = vstv %s370_s6  ;;  %s376_s12 = sld [smem:[#allocation2 + $0x2f]]  ;;  %v214_v9 = vadd.f32 %v213_v61, %v193_v60 }
  0x42   :  { %v226_v7 = vmul.f32 %v225_v5, %v219_v59  ;;  %v229_v8 = vstv %s371_s7  ;;  %s377_s13 = sld [smem:[#allocation2 + $0x30]]  ;;  %v218_v13 = vadd.f32 %v217_v1, %v197_v63 }
  0x43   :  { %v230_v10 = vmul.f32 %v229_v8, %v219_v59  ;;  %v233_v11 = vstv %s372_s8  ;;  %s378_s14 = sld [smem:[#allocation2 + $0x31]]  ;;  %v223_v14 = vadd.f32 %v222_v4, %v202_v0 }
  0x44   :  { %v234_v15 = vmul.f32 %v233_v11, %v219_v59  ;;  %v237_v16 = vstv %s373_s9  ;;  %s597_s15 = sld [smem:[#allocation2 + $0x3c]]  ;;  %v227_v17 = vadd.f32 %v226_v7, %v206_v3 }
  0x45   :  { %v238_v18 = vmul.f32 %v237_v16, %v219_v59  ;;  %v242_v19 = vstv %s374_s10  ;;  %s380_s16 = sld [smem:[#allocation2 + $0x37]]  ;;  %v231_v20 = vadd.f32 %v230_v10, %v210_v6 }
  0x46   :  { %v243_v21 = vmul.f32 %v242_v19, %v240_v12  ;;  %v246_v22 = vstv %s375_s11  ;;  %s381_s17 = sld [smem:[#allocation2 + $0x38]]  ;;  %v235_v23 = vadd.f32 %v234_v15, %v214_v9 }
  0x47   :  { %v247_v24 = vmul.f32 %v246_v22, %v240_v12  ;;  %v250_v25 = vstv %s376_s12  ;;  %s382_s18 = sld [smem:[#allocation2 + $0x39]]  ;;  %v239_v26 = vadd.f32 %v238_v18, %v218_v13 }
  0x48   :  { %v244_v27 = vadd.f32 %v243_v21, %v223_v14  ;;  %v251_v28 = vmul.f32 %v250_v25, %v240_v12  ;;  %v254_v29 = vstv %s377_s13  ;;  %s383_s19 = sld [smem:[#allocation2 + $0x3a]] }
  0x49   :  { %v248_v30 = vadd.f32 %v247_v24, %v227_v17  ;;  %v255_v31 = vmul.f32 %v254_v29, %v240_v12  ;;  %v258_v32 = vstv %s378_s14  ;;  %s384_s0 = sld [smem:[#allocation2 + $0x3b]] }
  0x4a   :  { %v252_v33 = vadd.f32 %v251_v28, %v231_v20  ;;  %v259_v34 = vmul.f32 %v258_v32, %v240_v12  ;;  %v264_v35 = vmax.f32 %v244_v27, 0.0  ;;  %v262_v37 = vstv %s597_s15 }
  0x4b   :  { %v256_v36 = vadd.f32 %v255_v31, %v235_v23  ;;  %v265_v38 = vstv %s380_s16  ;;  %v269_v39 = vmax.f32 %v248_v30, 0.0 }
  0x4c   :  { %v260_v40 = vadd.f32 %v259_v34, %v239_v26  ;;  %v266_v41 = vmul.f32 %v265_v38, %v264_v35  ;;  %v270_v42 = vstv %s381_s17  ;;  %v274_v43 = vmax.f32 %v252_v33, 0.0 }
  0x4d   :  { %v271_v44 = vmul.f32 %v270_v42, %v269_v39  ;;  %v275_v45 = vstv %s382_s18  ;;  %v279_v46 = vmax.f32 %v256_v36, 0.0 }
  0x4e   :  { %v267_v47 = vadd.f32 %v266_v41, %v262_v37  ;;  %v276_v48 = vmul.f32 %v275_v45, %v274_v43  ;;  %v280_v49 = vstv %s383_s19  ;;  %v284_v50 = vmax.f32 %v260_v40, 0.0 }
  0x4f   :  { %v285_v51 = vstv %s384_s0  ;;  %v281_v53 = vmul.f32 %v280_v49, %v279_v46 }
  0x50   :  { %v272_v52 = vadd.f32 %v271_v44, %v267_v47  ;;  %v286_v55 = vmul.f32 %v285_v51, %v284_v50 }
  0x52   :  { %v277_v54 = vadd.f32 %v276_v48, %v272_v52 }
  0x54   :  { %v282_v56 = vadd.f32 %v281_v53, %v277_v54 }
  0x56   :  { %v287_v57 = vadd.f32 %v286_v55, %v282_v56 }
  0x58   :  { %v288_v58 = vsub.f32 0.0, %v287_v57 }
  0x5a   :  { %v289_v59 = vmul.f32 1.442695, %v288_v58 }
  0x5c   :  { %390 = vpow2.f32 %v289_v59 }
  0x62   :  { %v391_v60 = vpop.eup %390 }
  0x63   :  { %v291_v61 = vadd.f32 1.0, %v391_v60 }
  0x65   :  { %392 = vrcp.f32 %v291_v61  ;;  %v303_v0 = vand.u32 2147483648, %v291_v61  ;;  %vm297_vm0 = vweird.f32 %v291_v61  ;;  %v301_v2 = vand.u32 2147483647, %v291_v61 }
  0x67   :  { %v304_v4 = vor.u32 1.1754944e-38, %v303_v0  ;;  %vm302_vm3 = vcmp.eq.f32.partialorder %v301_v2, 8.507059e+37 }
  0x6b   :  { %v393_v62 = vpop.eup %392 }
  0x6c   :  { %v293_v63 = vmul.f32 %v393_v62, %v291_v61  ;;  %vm298_vm1 = vweird.f32 %v393_v62 }
  0x6d   :  { %vm299_vm2 = vmor %vm297_vm0, %vm298_vm1 }
  0x6e   :  { %v294_v1 = vsub.f32 1.0, %v293_v63 }
  0x70   :  { %v295_v3 = vmul.f32 %v393_v62, %v294_v1 }
  0x72   :  { %v296_v5 = vadd.f32 %v393_v62, %v295_v3 }
  0x74   :  { %v300_v6 = vsel %vm299_vm2, %v393_v62, %v296_v5 }
  0x75   :  { %v305_v7 = vsel %vm302_vm3, %v304_v4, %v300_v6 }
  0x76   :  { %306 = vst [vmem:[#allocation7] sm:$0x1] %v305_v7 }
  0x77   :  { %317 = dma.vmem_to_hbm [thread:$0]  %s313_s21, 16, %s315_s23, [#allocation4]  }
  0x78   :  { %458 = dma.done.wait [#allocation4], 16  }
  0x79   :  { %459 = vsyncadd [#allocation4], 4294967280 }
  0x7a   :  { %322 = vsyncpa [#allocation3], 1 }
  0x7b   :  { %323 = vsyncpa [#allocation4], 1 }
  0x7c   :  { %324 = vsyncpa [#allocation5], 1 }

</bundles_post_ra>
